<compile_context>
chip_gen: v7x
topology: tpu7x:2x2x1
jax: 0.10.0
libtpu: 0.0.40
codegen_flags: <defaults>
</compile_context>

<pallas_src>
import functools
import math

import jax
import jax.numpy as jnp
from jax.experimental import pallas as pl
from jax.experimental.pallas import tpu as pltpu


# ----------------------------------------------------------------------------
# pe buffer construction (mirrors torch __init__; constant, plain JAX glue)
# ----------------------------------------------------------------------------
def make_pe_table(d_model: int, max_len: int = 5000, dtype=jnp.float32):
    position = jnp.arange(max_len, dtype=jnp.float32)[:, None]            # (L, 1)
    div_term = jnp.exp(
        jnp.arange(0, d_model, 2, dtype=jnp.float32) * (-math.log(10000.0) / d_model)
    )                                                                     # (D/2,)
    angles = position * div_term                                          # (L, D/2)
    pe = jnp.zeros((max_len, d_model), jnp.float32)
    pe = pe.at[:, 0::2].set(jnp.sin(angles))
    pe = pe.at[:, 1::2].set(jnp.cos(angles))
    # pe.unsqueeze(0).transpose(0, 1)  ->  (max_len, 1, d_model)
    return pe[:, None, :].astype(dtype)


# ----------------------------------------------------------------------------
# kernels
# ----------------------------------------------------------------------------
def _pe_add_kernel(x_ref, pe_ref, o_ref, *, batch):
    # x_ref: (tile_s, B*D), pe_ref: (tile_s, D). Broadcast pe over batch by
    # tiling along the lane axis (cheap VMEM/VALU work, no extra HBM traffic).
    pe_b = jnp.tile(pe_ref[...], (1, batch))
    o_ref[...] = (x_ref[...] + pe_b).astype(o_ref.dtype)


def _pe_add_dropout_kernel(x_ref, pe_ref, bits_ref, o_ref, *,
                           batch, threshold, inv_keep):
    # Inverted dropout: keep iff bits >= round(p * 2**32)  (P(keep) = 1-p),
    # kept values scaled by 1/(1-p).
    pe_b = jnp.tile(pe_ref[...], (1, batch))
    y = x_ref[...] + pe_b
    keep = bits_ref[...] >= jnp.uint32(threshold)
    o_ref[...] = jnp.where(keep, y * inv_keep, 0.0).astype(o_ref.dtype)


# ----------------------------------------------------------------------------
# tile sizing helpers
# ----------------------------------------------------------------------------
def _vmem_capacity_bytes():
    try:
        return int(pltpu.get_tpu_info().vmem_capacity_bytes)
    except Exception:
        # Conservative fallback (v7x per-TensorCore physical VMEM).
        return 64 * 1024 * 1024


def _choose_tile_s(S, bytes_per_row, budget):
    """Largest tile_s (multiple of 8) whose double-buffered working set fits
    `budget`, then split so the grid has >= 2 steps when S permits (v7x)."""
    max_rows = max(8, budget // max(bytes_per_row, 1))
    tile = min(S, max_rows)
    tile = max(8, (tile // 8) * 8)
    if tile >= S and S > 8:
        # Keep at least two grid steps so both v7x TensorCores get work.
        tile = max(8, (((S + 1) // 2) + 7) // 8 * 8)
    return tile


# ----------------------------------------------------------------------------
# wrapper
# ----------------------------------------------------------------------------
def positional_encoding(x, pe, *, dropout_p=0.1, training=False, seed=0,
                        tile_s=None):
    """x: (S, B, D); pe: (max_len, 1, D) with max_len >= S. Returns (S, B, D)."""
    S, B, D = x.shape
    BD = B * D
    dtype = x.dtype
    assert pe.shape[0] >= S, "pe table shorter than sequence"

    # Lane-dense 2-D views (free for row-major layouts).
    x2 = x.reshape(S, BD)
    pe2 = pe.reshape(pe.shape[0], D).astype(dtype)   # full table, no [:S] slice

    use_dropout = bool(training) and float(dropout_p) > 0.0

    # ---- VMEM-budgeted tile size + explicit scoped-VMEM limit ----------------
    cap = _vmem_capacity_bytes()
    vmem_limit = min(int(cap * 3 // 4), 96 * 1024 * 1024)
    if tile_s is None:
        itm = int(jnp.dtype(dtype).itemsize)
        bytes_per_row = 2 * (BD * itm                       # x block (2x buffered)
                             + BD * itm                     # out block
                             + (BD * 4 if use_dropout else 0)  # bits block
                             + D * itm)                     # pe block
        tile_s = _choose_tile_s(S, bytes_per_row, vmem_limit // 2)
    else:
        tile_s = max(8, (int(tile_s) // 8) * 8)

    grid = (pl.cdiv(S, tile_s),)   # partial tail block handled by Pallas padding

    x_spec = pl.BlockSpec((tile_s, BD), lambda i: (i, 0))
    pe_spec = pl.BlockSpec((tile_s, D), lambda i: (i, 0))
    o_spec = pl.BlockSpec((tile_s, BD), lambda i: (i, 0))
    out_shape = jax.ShapeDtypeStruct((S, BD), dtype)

    cparams = pltpu.CompilerParams(
        dimension_semantics=("parallel",),
        vmem_limit_bytes=int(vmem_limit),
    )

    if not use_dropout:
        y2 = pl.pallas_call(
            functools.partial(_pe_add_kernel, batch=B),
            out_shape=out_shape,
            grid=grid,
            in_specs=[x_spec, pe_spec],
            out_specs=o_spec,
            compiler_params=cparams,
        )(x2, pe2)
        return y2.reshape(S, B, D)

    p = float(dropout_p)
    threshold = min(int(round(p * (2 ** 32))), 2 ** 32 - 1)
    inv_keep = 1.0 / (1.0 - p)
    bits = jax.random.bits(jax.random.PRNGKey(seed), (S, BD), dtype=jnp.uint32)

    y2 = pl.pallas_call(
        functools.partial(_pe_add_dropout_kernel, batch=B,
                          threshold=threshold, inv_keep=inv_keep),
        out_shape=out_shape,
        grid=grid,
        in_specs=[x_spec, pe_spec, x_spec],   # bits share the x block layout
        out_specs=o_spec,
        compiler_params=cparams,
    )(x2, pe2, bits)
    return y2.reshape(S, B, D)


# ----------------------------------------------------------------------------
# demo / correctness check
# ----------------------------------------------------------------------------
if __name__ == "__main__":
    S, B, D = 16, 2, 32          # seq=16, batch=2, d_model=32
    MAX_LEN = 64                 # small synthetic max_len (module default 5000)

    key = jax.random.PRNGKey(0)
    x = jax.random.normal(key, (S, B, D), dtype=jnp.float32)
    pe = make_pe_table(D, max_len=MAX_LEN)

    # Eval mode (dropout is identity) — deterministic, checked vs reference.
    y = positional_encoding(x, pe, dropout_p=0.1, training=False)
    y = jax.block_until_ready(y)
    y_ref = x + pe[:S]
    assert y.shape == (S, B, D)
    assert jnp.allclose(y, y_ref, atol=1e-6), "f32 eval mismatch vs reference"

    # Eval mode with bf16 activations (bandwidth-halving path).
    x_bf = x.astype(jnp.bfloat16)
    y_bf = positional_encoding(x_bf, pe, dropout_p=0.1, training=False)
    y_bf = jax.block_until_ready(y_bf)
    y_bf_ref = x_bf + pe[:S].astype(jnp.bfloat16)
    assert y_bf.dtype == jnp.bfloat16
    assert jnp.allclose(y_bf.astype(jnp.float32), y_bf_ref.astype(jnp.float32),
                        atol=2e-2), "bf16 eval mismatch vs reference"

    # Training mode — exercises the dropout path (integer-threshold mask).
    p = 0.1
    y_tr = positional_encoding(x, pe, dropout_p=p, training=True, seed=123)
    y_tr = jax.block_until_ready(y_tr)
    assert y_tr.shape == (S, B, D)
    scaled = y_ref * (1.0 / (1.0 - p))
    ok = (jnp.abs(y_tr) <= 1e-6) | (jnp.abs(y_tr - scaled) <= 1e-4)
    assert bool(jnp.all(ok)), "dropout outputs are not in {0, (x+pe)/(1-p)}"

    print("KERNEL_OK")
</pallas_src>

<mosaic_0001>
module attributes {stable_mosaic.version = 11 : i64} {
  func.func @_pe_add_kernel(%arg0: i32, %arg1: memref<8x64xf32, #tpu.memory_space<vmem>>, %arg2: memref<8x32xf32, #tpu.memory_space<vmem>>, %arg3: memref<8x64xf32, #tpu.memory_space<vmem>>) attributes {dimension_semantics = [#tpu.dimension_semantics<parallel>], iteration_bounds = array<i64: 2>, scalar_prefetch = 0 : i64, scratch_operands = 0 : i64, tpu.core_type = #tpu.core_type<tc>, window_params = [{transform_indices = @transform_0, window_bounds = array<i64: 8, 64>}, {transform_indices = @transform_1, window_bounds = array<i64: 8, 32>}, {transform_indices = @transform_2, window_bounds = array<i64: 8, 64>}]} {
    %c0 = arith.constant 0 : index
    %c0_0 = arith.constant 0 : index
    %0 = vector.load %arg2[%c0, %c0_0] : memref<8x32xf32, #tpu.memory_space<vmem>>, vector<8x32xf32>
    %1 = tpu.concatenate %0, %0 in 1 : vector<8x32xf32>, vector<8x32xf32> -> vector<8x64xf32>
    %c0_1 = arith.constant 0 : index
    %c0_2 = arith.constant 0 : index
    %2 = vector.load %arg1[%c0_1, %c0_2] : memref<8x64xf32, #tpu.memory_space<vmem>>, vector<8x64xf32>
    %3 = arith.addf %2, %1 : vector<8x64xf32>
    %c0_3 = arith.constant 0 : index
    %c0_4 = arith.constant 0 : index
    %4 = vector.load %arg3[%c0_3, %c0_4] : memref<8x64xf32, #tpu.memory_space<vmem>>, vector<8x64xf32>
    tpu.vector_store %arg3[%c0_3, %c0_4], %3 {strides = array<i32>} : memref<8x64xf32, #tpu.memory_space<vmem>>, vector<8x64xf32>,
    return
  }
  func.func @transform_0(%arg0: i32) -> (i32, i32) {
    %c0_i32 = arith.constant 0 : i32
    %c0_i32_0 = arith.constant 0 : i32
    return %arg0, %c0_i32 : i32, i32
  }
  func.func @transform_1(%arg0: i32) -> (i32, i32) {
    %c0_i32 = arith.constant 0 : i32
    %c0_i32_0 = arith.constant 0 : i32
    return %arg0, %c0_i32 : i32, i32
  }
  func.func @transform_2(%arg0: i32) -> (i32, i32) {
    %c0_i32 = arith.constant 0 : i32
    %c0_i32_0 = arith.constant 0 : i32
    return %arg0, %c0_i32 : i32, i32
  }
}

</mosaic_0001>

<bundles_post_ra>
// kernel: tpu_custom_call.1
= control target key start
LH: loop header
LB: loop body
LE: loop exit
PB: predicated region body
PF: predicated region fallthrough
CT: control target
= control target key end

     0   :  { %7 = vsyncpa [#allocation3], 0  ;;  %s489_s0 = inlined_call_operand.vmem [shape: f32[16,64], index: 0, kind: input, shape index: {}]   ;;  %s490_s1 = inlined_call_operand.vmem [shape: f32[64,32], index: 1, kind: input, shape index: {}]   ;;  %s491_s2 = inlined_call_operand.hbm [shape: f32[16,64], index: 2, kind: output, shape index: {}]  }
   0x1   :  { %9 = vsyncpa [#allocation3 + $0x1], 0  ;;  %s384_s9 = smov 0   ;;  %s386_s10 = smov 0  }
   0x2   :  { %s388_s11 = smov 0   ;;  %s390_s12 = smov 0  }
   0x3 LB: > { %s405_s13 = sadd.s32 4294967295, %s365_s12   ;;  %s252_s14 = sadd.s32 4294967294, %s365_s12   ;;  %s365_s12 = sphi %s390_s12, %s497_s12   ;;  %s361_s11 = sphi %s388_s11, %s496_s11   ;;  %s357_s10 = sphi %s386_s10, %s495_s10   ;;  %s353_s9 = sphi %s384_s9, %s494_s9  }
   0x4   : > { %s409_s15 = sadd.s32 1, %s365_s12   ;;  %s74_s16 = sadd.s32 1, %s361_s11 }
   0x5   : > { %s71_s17 = ssub.s32 %s365_s12, %s409_s15  ;;  %p84_p0 = scmp.ne.s32.totalorder %s361_s11, %s357_s10 }
   0x6   : > { %p72_p1 = scmp.eq.s32.totalorder %s71_s17, 0  ;;  %p85_p2 = scmp.eq.s32.totalorder %s405_s13, 1 }
   0x7   : > { %p90_p3 = scmp.ne.s32.totalorder %s357_s10, %s353_s9  ;;  %p91_p4 = scmp.eq.s32.totalorder %s252_s14, 1 }
   0x8   : > { %s420_s18 = scalar_select %p72_p1, %s361_s11, %s74_s16  }
   0x9   : > { %p422_p5 = por %p85_p2, %p84_p0  ;;  %p426_p6 = por %p91_p4, %p90_p3 }
   0xa   : > { %p255_p7 = scmp.ge.s32.totalorder %s365_s12, 1  ;;  %p123_p8 = scmp.lt.s32.totalorder %s365_s12, 3 }
   0xc   : > { %p124_p9 = pnand %p255_p7, %p123_p8 }
   0xd   : > { %p152_p10 = scmp.lt.s32.totalorder (!%p124_p9), %s405_s13, 7  ;;  %s367_s26 = smov (!%p124_p9), 32   ;;  %vm161_vm0 = vcmask (!%p124_p9), 261120   ;;  %vm165_vm1 = vcmask (!%p124_p9), 523264  }
   0xe   : > { %127 = sbr.rel (%p124_p9) target bundleno = 158 (0x9e), region = 28  ;;  %p148_p11 = scmp.lt.s32.totalorder (!%p124_p9), %s405_s13, 1 }
   0xf   : > { %s145_s28 = sand.u32 (!%p124_p9), 1, %s357_s10   ;;  %s260_s6 = sshll.u32 (!%p124_p9), %s405_s13, 7 }
  0x10   : > { %s256_s30 = sshll.u32 (!%p124_p9), %s145_s28, 3  ;;  %s447_s17 = scalar_lea.hbm (!%p124_p9), %s491_s2, %s260_s6 }
  0x11   : > { %s147_s7 = scalar_lea.vmem (!%p124_p9), [#allocation2], %s256_s30 }
  0x12   : > { %s181_s8 = sshll.u32 (!%p124_p9), %s147_s7, 4  ;;  %s449_s8 = int_to_ptr.vmem [resolvable:$true] %s181_s8 }
  0x15   : > { %s153_s21 = scalar_select %p152_p10, %s405_s13, 7 }
  0x16   : > { %s149_s27 = scalar_select %p148_p11, %s405_s13, 1 }
  0x17   : > { %s258_s22 = sshll.u32 %s153_s21, 3  ;;  %s168_s21 = scalar_lea.sflag [#allocation3], %s145_s28 }
  0x18   : > { %s155_s25 = scalar_lea.vmem %s490_s1, %s258_s22  ;;  %s257_s29 = sshll.u32 %s149_s27, 3 }
  0x19   : > { %v156_v0 = vld [vmem:[%s155_s25] sm:$0xff]  ;;  %s151_s5 = scalar_lea.vmem %s489_s0, %s257_s29  ;;  %s303_s22 = scalar_lea.vmem %s449_s8, 128 }
  0x1a   : > { %158 = vrot.lane.b32.xlu0 %v156_v0, %s367_s26  ;;  %v163_v1 = vld [vmem:[%s151_s5] sm:$0xff]  ;;  %p304_p12 = scmp.ne.s32.totalorder %s449_s8, %s303_s22  ;;  %s368_s13 = smov [#allocation2]  }
  0x1b   : > { %s307_s23 = sshll.u32 %s368_s13, 4  ;;  %s308_s23 = int_to_ptr.vmem [resolvable:$false] %s307_s23 }
  0x1c   : > { %p305_p13 = pnand %p304_p12, %p422_p5  ;;  %s309_s24 = scalar_lea.vmem %s308_s23, 256 }
  0x1d   : > { %p310_p1 = scmp.lt.s32.totalorder %s449_s8, %s308_s23  ;;  %p311_p2 = scmp.lt.s32.totalorder %s309_s24, %s303_s22 }
  0x1e   : > { %p306_p0 = pneg %p305_p13 }
  0x1f   : > { %p312_p3 = por %p311_p2, %p310_p1 }
  0x21   : > { %p313_p4 = pnand %p312_p3, %p306_p0 }
  0x8c   : > { %v159_v2 = vpop.permute.xlu0 %158 }
  0x8d   : > { %v162_v3 = vsel %vm161_vm0, %v156_v0, %v159_v2 }
  0x8e   : > { %v164_v4 = vadd.f32 %v163_v1, %v162_v3 }
  0x90   : > { %166 = vst.msk [vmem:[%s147_s7] sm:$0xff] %vm165_vm1, %v164_v4 }
  0x91   : > { %316 = shalt.err (!%p313_p4)
}
  0x92   : > { %s317_s25 = scalar_lea.hbm %s447_s17, 128  ;;  %s321_s28 = scalar_lea.hbm %s491_s2, 256 }
  0x93   : > { %p318_p7 = scmp.ne.s32.totalorder %s447_s17, %s317_s25  ;;  %p322_p10 = scmp.lt.u32.totalorder %s447_s17, %s491_s2 }
  0x94   : > { %p323_p11 = scmp.lt.u32.totalorder %s321_s28, %s317_s25  ;;  %p325_p13 = scmp.lt.u32.totalorder %s317_s25, %s447_s17 }
  0x95   : > { %p319_p8 = pnand %p318_p7, %p422_p5 }
  0x96   : > { %p324_p12 = por %p323_p11, %p322_p10 }
  0x97   : > { %p320_p9 = pneg %p319_p8 }
  0x98   : > { %p326_p0 = por %p325_p13, %p324_p12 }
  0x9a   : > { %p327_p1 = pnand %p326_p0, %p320_p9 }
  0x9c   : > { %330 = shalt.err (!%p327_p1)
}
  0x9d   : > { %263 = dma.vmem_to_hbm [thread:$0]  (%p422_p5), %s449_s8, 128, %s447_s17, %s168_s21  }
  0x9e PF: > { %p269_p2 = scmp.ge.s32.totalorder %s365_s12, 2  ;;  %s193_s3 = sand.u32 1, %s353_s9  }
  0x9f   : > { %s194_s4 = scalar_lea.sflag [#allocation3], %s193_s3 }
  0xa0   : > { %p266_p3 = pnand %p269_p2, %p426_p6 }
  0xa2   : > { %348 = dma.done.wait (!%p266_p3), %s194_s4, 128  }
  0xa3   : > { %350 = vsyncadd (!%p266_p3), %s194_s4, 4294967168  ;;  %p12_p4 = scmp.ge.s32.totalorder %s409_s15, 4   ;;  %s494_s9 = smov %s357_s10 }
  0xa4   : > { %s495_s10 = smov %s361_s11  ;;  %s496_s11 = smov %s420_s18 }
  0xa5   : > { %s497_s12 = smov %s409_s15  ;;  %14 = sbr.rel (!%p12_p4) target bundleno = 3 (0x3), region = 66 }
  0xac   :  { %199 = vsyncpa [#allocation3], 1 }
  0xad   :  { %201 = vsyncpa [#allocation3 + $0x1], 1 }

</bundles_post_ra>
